<compile_context>
chip_gen: v7x
topology: tpu7x:2x2x1
jax: 0.10.0
libtpu: 0.0.40
codegen_flags: <defaults>
</compile_context>

<pallas_src>
import jax
import jax.numpy as jnp
from jax.experimental import pallas as pl
from jax.experimental.pallas import tpu as pltpu


def _round_up(x, m):
    return ((x + m - 1) // m) * m


def _mlp_kernel(xT_ref, w1_ref, b1_ref, w2_ref, b2_ref, w3_ref, b3_ref, oT_ref):
    """One lane-tile of the transposed MLP.

    xT : (c_in,  n_tile)  samples on the lane axis (lane-dense)
    wK : (outK,  inK)     resident transposed weights (full, ~7 KB total)
    bK : (outK,  1)       f32 biases, broadcast along lanes
    oT : (c_out, n_tile)  lane-dense output (unmasked stores)
    """
    cdt = xT_ref.dtype  # MXU operand dtype (f32 or bf16); accumulation always f32
    # hidden layer 1: Linear + ReLU
    h = jnp.dot(w1_ref[...], xT_ref[...], preferred_element_type=jnp.float32)
    h = jnp.maximum(h + b1_ref[...], 0.0)
    # hidden layer 2: Linear + ReLU
    h = jnp.dot(w2_ref[...], h.astype(cdt), preferred_element_type=jnp.float32)
    h = jnp.maximum(h + b2_ref[...], 0.0)
    # output layer: Linear + identity out_act (dropout=0.0 -> Identity)
    o = jnp.dot(w3_ref[...], h.astype(cdt), preferred_element_type=jnp.float32)
    oT_ref[...] = (o + b3_ref[...]).astype(oT_ref.dtype)


def mlp_pallas(x, params, *, block_n=8192):
    """Fused MLP forward.

    x:       [N, c_in] (float32 or bfloat16; dots accumulate in f32 either way)
    params:  (w1, b1, w2, b2, w3, b3), weights stored [in, out], biases [1, out]
    block_n: samples (lanes) per grid step; clamped so small N stays a 1-2 step grid
             and medium/large N keeps >= 2 steps for v7x's two TensorCores.
    """
    w1, b1, w2, b2, w3, b3 = params
    n, c_in = x.shape
    h1, h2, c_out = w1.shape[1], w2.shape[1], w3.shape[1]
    cdt = x.dtype
    out_dtype = x.dtype

    # --- choose lane tile (samples per grid step) ----------------------------
    cols = _round_up(max(n, 1), 128)                      # lane-aligned sample count
    blk = max(128, _round_up(block_n, 128))
    blk = min(blk, cols)                                   # tiny N -> single step
    if cols >= 256:                                        # enough work for >= 2 steps
        blk = min(blk, _round_up(-(-n // 2), 128))         # v7x: keep both TCs busy
    n_pad = _round_up(max(n, 1), blk)

    # --- wrapper-side layout plumbing (plain XLA, outside the kernel) --------
    xT = jnp.pad(x, ((0, n_pad - n), (0, 0))).T            # (c_in, n_pad), lane = sample
    w1T = w1.T.astype(cdt)                                  # (h1, c_in)   ~ KBs
    w2T = w2.T.astype(cdt)                                  # (h2, h1)
    w3T = w3.T.astype(cdt)                                  # (c_out, h2)
    b1c = b1.reshape(-1, 1).astype(jnp.float32)             # (h1, 1)
    b2c = b2.reshape(-1, 1).astype(jnp.float32)             # (h2, 1)
    b3c = b3.reshape(-1, 1).astype(jnp.float32)             # (c_out, 1)

    grid = (n_pad // blk,)
    itemsize = jnp.dtype(cdt).itemsize
    flops = 2 * n_pad * (c_in * h1 + h1 * h2 + h2 * c_out)
    bytes_accessed = (
        xT.size * itemsize
        + n_pad * c_out * jnp.dtype(out_dtype).itemsize
        + (w1T.size + w2T.size + w3T.size) * itemsize
        + (b1c.size + b2c.size + b3c.size) * 4
    )

    lane_map = lambda i: (0, i)    # sample-tiled arrays (tile along lane axis)
    rep_map = lambda i: (0, 0)     # grid-invariant weights/biases (stay resident)

    outT = pl.pallas_call(
        _mlp_kernel,
        out_shape=jax.ShapeDtypeStruct((c_out, n_pad), out_dtype),
        grid_spec=pltpu.PrefetchScalarGridSpec(
            num_scalar_prefetch=0,
            grid=grid,
            in_specs=[
                pl.BlockSpec((c_in, blk), lane_map),   # x^T tile (lane dense)
                pl.BlockSpec(w1T.shape, rep_map),      # W1^T (full, resident)
                pl.BlockSpec(b1c.shape, rep_map),      # b1
                pl.BlockSpec(w2T.shape, rep_map),      # W2^T
                pl.BlockSpec(b2c.shape, rep_map),      # b2
                pl.BlockSpec(w3T.shape, rep_map),      # W3^T
                pl.BlockSpec(b3c.shape, rep_map),      # b3
            ],
            out_specs=pl.BlockSpec((c_out, blk), lane_map),  # lane-dense output
        ),
        compiler_params=pltpu.CompilerParams(
            dimension_semantics=("parallel",),       # shard sample tiles across TCs
            vmem_limit_bytes=32 * 1024 * 1024,       # explicit, safe on v5e/v6e/v7x
        ),
        cost_estimate=pl.CostEstimate(
            flops=flops, transcendentals=0, bytes_accessed=bytes_accessed),
    )(xT, w1T, b1c, w2T, b2c, w3T, b3c)

    return outT.T[:n]                                 # back to [N, c_out]


def init_mlp_params(key, c_in, middle_channels, c_out, dtype=jnp.float32):
    """Deterministic init mirroring nn.Linear shapes (weights stored transposed: [in, out])."""
    c_ins = [c_in] + list(middle_channels)
    c_outs = list(middle_channels) + [c_out]
    params = []
    for fan_in, fan_out in zip(c_ins, c_outs):
        key, kw, kb = jax.random.split(key, 3)
        bound = 1.0 / (fan_in ** 0.5)  # PyTorch nn.Linear default init range
        w = jax.random.uniform(kw, (fan_in, fan_out), dtype, -bound, bound)
        b = jax.random.uniform(kb, (1, fan_out), dtype, -bound, bound)
        params.extend([w, b])
    return tuple(params)


def mlp_reference(x, params, compute_dtype=None):
    """Pure-JAX reference (mirrors the kernel's optional low-precision operands)."""
    w1, b1, w2, b2, w3, b3 = params
    cdt = compute_dtype or x.dtype
    h = jnp.dot(x.astype(cdt), w1.astype(cdt), preferred_element_type=jnp.float32) + b1
    h = jnp.maximum(h, 0.0)
    h = jnp.dot(h.astype(cdt), w2.astype(cdt), preferred_element_type=jnp.float32) + b2
    h = jnp.maximum(h, 0.0)
    return jnp.dot(h.astype(cdt), w3.astype(cdt), preferred_element_type=jnp.float32) + b3


if __name__ == "__main__":
    # MLP(c_in=16, c_out=8, middle_channels=[32, 32], hidden_act='relu',
    #     out_act='identity', dropout=0.0)
    c_in, c_out = 16, 8
    middle_channels = [32, 32]
    N = 128

    key = jax.random.PRNGKey(0)
    key, kx = jax.random.split(key)
    x = jax.random.normal(kx, (N, c_in), jnp.float32)
    params = init_mlp_params(key, c_in, middle_channels, c_out)

    # f32 path (tight check); tiny N -> single grid step.
    out = jax.block_until_ready(mlp_pallas(x, params))
    ref = mlp_reference(x, params)
    assert out.shape == (N, c_out), out.shape
    assert jnp.allclose(out, ref, atol=1e-4, rtol=1e-4), \
        float(jnp.max(jnp.abs(out - ref)))

    # Ragged N (padding + slice path).
    x_r = x[:100]
    out_r = jax.block_until_ready(mlp_pallas(x_r, params))
    ref_r = mlp_reference(x_r, params)
    assert out_r.shape == (100, c_out), out_r.shape
    assert jnp.allclose(out_r, ref_r, atol=1e-4, rtol=1e-4), \
        float(jnp.max(jnp.abs(out_r - ref_r)))

    # Multi-step grid path (>=2 steps so both v7x TCs would get work).
    key, km = jax.random.split(key)
    x_m = jax.random.normal(km, (300, c_in), jnp.float32)
    out_m = jax.block_until_ready(mlp_pallas(x_m, params))
    ref_m = mlp_reference(x_m, params)
    assert out_m.shape == (300, c_out), out_m.shape
    assert jnp.allclose(out_m, ref_m, atol=1e-4, rtol=1e-4), \
        float(jnp.max(jnp.abs(out_m - ref_m)))

    # bf16 activations/weights, f32 accumulation (halves HBM read on large N).
    out_bf = jax.block_until_ready(mlp_pallas(x.astype(jnp.bfloat16), params))
    ref_bf = mlp_reference(x, params, compute_dtype=jnp.bfloat16)
    assert out_bf.shape == (N, c_out), out_bf.shape
    assert jnp.allclose(out_bf.astype(jnp.float32), ref_bf, atol=3e-2, rtol=3e-2), \
        float(jnp.max(jnp.abs(out_bf.astype(jnp.float32) - ref_bf)))

    print("KERNEL_OK")
</pallas_src>

<mosaic_0001>
module attributes {stable_mosaic.version = 11 : i64} {
  func.func @_mlp_kernel(%arg0: i32, %arg1: memref<16x128xf32, #tpu.memory_space<vmem>>, %arg2: memref<32x16xf32, #tpu.memory_space<vmem>>, %arg3: memref<32x1xf32, #tpu.memory_space<vmem>>, %arg4: memref<32x32xf32, #tpu.memory_space<vmem>>, %arg5: memref<32x1xf32, #tpu.memory_space<vmem>>, %arg6: memref<8x32xf32, #tpu.memory_space<vmem>>, %arg7: memref<8x1xf32, #tpu.memory_space<vmem>>, %arg8: memref<8x128xf32, #tpu.memory_space<vmem>>) attributes {dimension_semantics = [#tpu.dimension_semantics<parallel>], iteration_bounds = array<i64: 1>, scalar_prefetch = 0 : i64, scratch_operands = 0 : i64, tpu.core_type = #tpu.core_type<tc>, window_params = [{transform_indices = @transform_0, window_bounds = array<i64: 16, 128>}, {pipeline_mode = #tpu.pipeline_mode<synchronous>, transform_indices = @transform_1, window_bounds = array<i64: 32, 16>}, {pipeline_mode = #tpu.pipeline_mode<synchronous>, transform_indices = @transform_2, window_bounds = array<i64: 32, 1>}, {pipeline_mode = #tpu.pipeline_mode<synchronous>, transform_indices = @transform_3, window_bounds = array<i64: 32, 32>}, {pipeline_mode = #tpu.pipeline_mode<synchronous>, transform_indices = @transform_4, window_bounds = array<i64: 32, 1>}, {pipeline_mode = #tpu.pipeline_mode<synchronous>, transform_indices = @transform_5, window_bounds = array<i64: 8, 32>}, {pipeline_mode = #tpu.pipeline_mode<synchronous>, transform_indices = @transform_6, window_bounds = array<i64: 8, 1>}, {transform_indices = @transform_7, window_bounds = array<i64: 8, 128>}]} {
    %c0 = arith.constant 0 : index
    %c0_0 = arith.constant 0 : index
    %0 = vector.load %arg2[%c0, %c0_0] : memref<32x16xf32, #tpu.memory_space<vmem>>, vector<32x16xf32>
    %c0_1 = arith.constant 0 : index
    %c0_2 = arith.constant 0 : index
    %1 = vector.load %arg1[%c0_1, %c0_2] : memref<16x128xf32, #tpu.memory_space<vmem>>, vector<16x128xf32>
    %cst = arith.constant dense<0.000000e+00> : vector<32x128xf32>
    %2 = tpu.matmul %0, %1, %cst {dimension_numbers = #tpu.dot_dimension_numbers<[1], [0], [0], [1], [0, 0, 1, 1], [], []>} : vector<32x16xf32>, vector<16x128xf32>, vector<32x128xf32> -> vector<32x128xf32>
    %c0_3 = arith.constant 0 : index
    %c0_4 = arith.constant 0 : index
    %3 = vector.load %arg3[%c0_3, %c0_4] : memref<32x1xf32, #tpu.memory_space<vmem>>, vector<32x1xf32>
    %4 = vector.broadcast %3 : vector<32x1xf32> to vector<32x128xf32>
    %5 = arith.addf %2, %4 : vector<32x128xf32>
    %cst_5 = arith.constant 0.000000e+00 : f32
    %6 = vector.broadcast %cst_5 : f32 to vector<32x128xf32>
    %7 = arith.maximumf %5, %6 : vector<32x128xf32>
    %c0_6 = arith.constant 0 : index
    %c0_7 = arith.constant 0 : index
    %8 = vector.load %arg4[%c0_6, %c0_7] : memref<32x32xf32, #tpu.memory_space<vmem>>, vector<32x32xf32>
    %cst_8 = arith.constant dense<0.000000e+00> : vector<32x128xf32>
    %9 = tpu.matmul %8, %7, %cst_8 {dimension_numbers = #tpu.dot_dimension_numbers<[1], [0], [0], [1], [0, 0, 1, 1], [], []>} : vector<32x32xf32>, vector<32x128xf32>, vector<32x128xf32> -> vector<32x128xf32>
    %c0_9 = arith.constant 0 : index
    %c0_10 = arith.constant 0 : index
    %10 = vector.load %arg5[%c0_9, %c0_10] : memref<32x1xf32, #tpu.memory_space<vmem>>, vector<32x1xf32>
    %11 = vector.broadcast %10 : vector<32x1xf32> to vector<32x128xf32>
    %12 = arith.addf %9, %11 : vector<32x128xf32>
    %cst_11 = arith.constant 0.000000e+00 : f32
    %13 = vector.broadcast %cst_11 : f32 to vector<32x128xf32>
    %14 = arith.maximumf %12, %13 : vector<32x128xf32>
    %c0_12 = arith.constant 0 : index
    %c0_13 = arith.constant 0 : index
    %15 = vector.load %arg6[%c0_12, %c0_13] : memref<8x32xf32, #tpu.memory_space<vmem>>, vector<8x32xf32>
    %cst_14 = arith.constant dense<0.000000e+00> : vector<8x128xf32>
    %16 = tpu.matmul %15, %14, %cst_14 {dimension_numbers = #tpu.dot_dimension_numbers<[1], [0], [0], [1], [0, 0, 1, 1], [], []>} : vector<8x32xf32>, vector<32x128xf32>, vector<8x128xf32> -> vector<8x128xf32>
    %c0_15 = arith.constant 0 : index
    %c0_16 = arith.constant 0 : index
    %17 = vector.load %arg7[%c0_15, %c0_16] : memref<8x1xf32, #tpu.memory_space<vmem>>, vector<8x1xf32>
    %18 = vector.broadcast %17 : vector<8x1xf32> to vector<8x128xf32>
    %19 = arith.addf %16, %18 : vector<8x128xf32>
    %c0_17 = arith.constant 0 : index
    %c0_18 = arith.constant 0 : index
    %20 = vector.load %arg8[%c0_17, %c0_18] : memref<8x128xf32, #tpu.memory_space<vmem>>, vector<8x128xf32>
    tpu.vector_store %arg8[%c0_17, %c0_18], %19 {strides = array<i32>} : memref<8x128xf32, #tpu.memory_space<vmem>>, vector<8x128xf32>,
    return
  }
  func.func @transform_0(%arg0: i32) -> (i32, i32) {
    %c0_i32 = arith.constant 0 : i32
    %c0_i32_0 = arith.constant 0 : i32
    return %c0_i32, %arg0 : i32, i32
  }
  func.func @transform_1(%arg0: i32) -> (i32, i32) {
    %c0_i32 = arith.constant 0 : i32
    %c0_i32_0 = arith.constant 0 : i32
    %c0_i32_1 = arith.constant 0 : i32
    return %c0_i32, %c0_i32_0 : i32, i32
  }
  func.func @transform_2(%arg0: i32) -> (i32, i32) {
    %c0_i32 = arith.constant 0 : i32
    %c0_i32_0 = arith.constant 0 : i32
    %c0_i32_1 = arith.constant 0 : i32
    return %c0_i32, %c0_i32_0 : i32, i32
  }
  func.func @transform_3(%arg0: i32) -> (i32, i32) {
    %c0_i32 = arith.constant 0 : i32
    %c0_i32_0 = arith.constant 0 : i32
    %c0_i32_1 = arith.constant 0 : i32
    return %c0_i32, %c0_i32_0 : i32, i32
  }
  func.func @transform_4(%arg0: i32) -> (i32, i32) {
    %c0_i32 = arith.constant 0 : i32
    %c0_i32_0 = arith.constant 0 : i32
    %c0_i32_1 = arith.constant 0 : i32
    return %c0_i32, %c0_i32_0 : i32, i32
  }
  func.func @transform_5(%arg0: i32) -> (i32, i32) {
    %c0_i32 = arith.constant 0 : i32
    %c0_i32_0 = arith.constant 0 : i32
    %c0_i32_1 = arith.constant 0 : i32
    return %c0_i32, %c0_i32_0 : i32, i32
  }
  func.func @transform_6(%arg0: i32) -> (i32, i32) {
    %c0_i32 = arith.constant 0 : i32
    %c0_i32_0 = arith.constant 0 : i32
    %c0_i32_1 = arith.constant 0 : i32
    return %c0_i32, %c0_i32_0 : i32, i32
  }
  func.func @transform_7(%arg0: i32) -> (i32, i32) {
    %c0_i32 = arith.constant 0 : i32
    %c0_i32_0 = arith.constant 0 : i32
    return %c0_i32, %arg0 : i32, i32
  }
}

</mosaic_0001>

<bundles_post_ra>
// kernel: tpu_custom_call.1
= control target key start
LH: loop header
LB: loop body
LE: loop exit
PB: predicated region body
PF: predicated region fallthrough
CT: control target
= control target key end

     0   :  { %vm57_vm0 = vcmask 130048   ;;  %v496_v4 = vmov 0   ;;  %s622_s0 = inlined_call_operand.vmem [shape: f32[16,128], index: 0, kind: input, shape index: {}]   ;;  %s623_s1 = inlined_call_operand.vmem [shape: f32[32,16], index: 1, kind: input, shape index: {}]   ;;  %s624_s2 = inlined_call_operand.vmem [shape: f32[32,1], index: 2, kind: input, shape index: {}]   ;;  %s625_s3 = inlined_call_operand.vmem [shape: f32[32,32], index: 3, kind: input, shape index: {}]   ;;  %s626_s4 = inlined_call_operand.vmem [shape: f32[32,1], index: 4, kind: input, shape index: {}]   ;;  %s627_s5 = inlined_call_operand.vmem [shape: f32[8,32], index: 5, kind: input, shape index: {}]   ;;  %s628_s6 = inlined_call_operand.vmem [shape: f32[8,1], index: 6, kind: input, shape index: {}]   ;;  %s629_s7 = inlined_call_operand.hbm [shape: f32[8,128], index: 7, kind: output, shape index: {}]  }
   0x1   :  { %v31_v0 = vld [vmem:[%s622_s0] sm:$0xff]  ;;  %v32_v1 = vld [vmem:[%s622_s0 + $0x8] sm:$0xff]  ;;  %470 = vset.pattern.permute.xlu0 %v496_v4  ;;  %471 = vset.pattern.permute.xlu1 %v496_v4  ;;  %v35_v6 = vld [vmem:[%s624_s2 + $0x10] sm:$0xff] }
   0x2   :  { %v27_v2 = vld [vmem:[%s623_s1] sm:$0xff]  ;;  %v447_v3 = vpack.c.bf16 %v32_v1, %v31_v0  ;;  %v28_v7 = vld [vmem:[%s623_s1 + $0x8] sm:$0xff]  ;;  %49 = vperm.xlu1 %471, %v35_v6   ;;  %v29_v9 = vld [vmem:[%s623_s1 + $0x10] sm:$0xff] }
   0x3   :  { %416 = vmatprep.mubr.msk.f32.mxu0 %vm57_vm0, %v27_v2  ;;  %v33_v5 = vld [vmem:[%s624_s2] sm:$0xff]  ;;  %v34_v8 = vld [vmem:[%s624_s2 + $0x8] sm:$0xff]  ;;  %v36_v10 = vld [vmem:[%s624_s2 + $0x18] sm:$0xff] }
   0x4   :  { %448 = vmatprep.subr.bf16.mxu0 %v447_v3  ;;  %39 = vperm.xlu0 %470, %v33_v5  }
   0x5   :  { %450 = vmatpush3.bf16.msra.mxu0 %v447_v3 }
   0x6   :  { %12 = vsyncpa [#allocation3], 0  ;;  %v30_v11 = vld [vmem:[%s623_s1 + $0x18] sm:$0xff]  ;;  %v163_v12 = vld [vmem:[%s626_s4] sm:$0xff]  ;;  %54 = vperm.xlu1 %471, %v36_v10   ;;  %vm187_vm1 = vcmask 261120   ;;  %v497_v39 = vmov 0.0|0.0  }
   0x7   :  { %v164_v13 = vld [vmem:[%s626_s4 + $0x8] sm:$0xff]  ;;  %v165_v14 = vld [vmem:[%s626_s4 + $0x10] sm:$0xff]  ;;  %v166_v15 = vld [vmem:[%s626_s4 + $0x18] sm:$0xff]  ;;  %459 = vmatprep.subr.bf16.mxu0 %v497_v39  ;;  %vm498_vm2 = vmmov 0   ;;  %v499_v40 = vmov 0.0   ;;  %s500_s11 = smov [#allocation2]  }
   0x8   :  { %417 = vmatmul.mubr.msk.f32.vlgmr.msra.gmra.mrb[0].mxu0 %vm57_vm0, %v28_v7  ;;  %44 = vperm.xlu0 %470, %v34_v8   ;;  %v290_v16 = vld [vmem:[%s628_s6] sm:$0xff]  ;;  %v160_v36 = vld [vmem:[%s625_s3 + $0x8] sm:$0xff]  ;;  %v161_v37 = vld [vmem:[%s625_s3 + $0x10] sm:$0xff]  ;;  %s376_s12 = sshll.u32 %s500_s11, 4  ;;  %s377_s12 = int_to_ptr.vmem [resolvable:$true] %s376_s12 }
   0x9   :  { %419 = vmatprep.mubr.msk.f32.mxu0 %vm57_vm0, %v29_v9  ;;  %v159_v17 = vld [vmem:[%s625_s3] sm:$0xff]  ;;  %v162_v38 = vld [vmem:[%s625_s3 + $0x18] sm:$0xff]  ;;  %s472_s13 = scalar_lea.vmem %s377_s12, 128  ;;  %p477_p1 = scmp.lt.s32.totalorder %s377_s12, %s377_s12 }
   0xa   :  { %174 = vperm.xlu1 %471, %v164_v13   ;;  %430 = vmatprep.mubr.msk.f32.mxu1 %vm187_vm1, %v159_v17  ;;  %v289_v59 = vld [vmem:[%s627_s5] sm:$0xff]  ;;  %p473_p0 = scmp.ne.s32.totalorder %s377_s12, %s472_s13  ;;  %p478_p2 = scmp.lt.s32.totalorder %s472_s13, %s472_s13 }
   0xc   :  { %420 = vmatmul.mubr.msk.f32.gmra.mrb[2].mxu0 %vm57_vm0, %v30_v11  ;;  %169 = vperm.xlu0 %470, %v163_v12   ;;  %p479_p3 = por %p478_p2, %p477_p1 }
   0xd   :  { %444 = vmatprep.mubr.msk.f32.mxu0 %vm498_vm2, %v499_v40 }
   0xe   :  { %184 = vperm.xlu1 %471, %v166_v15   ;;  %p480_p4 = pnand %p479_p3, %p473_p0 }
  0x10   :  { %179 = vperm.xlu0 %470, %v165_v14  }
  0x14   :  { %293 = vperm.xlu0 %470, %v290_v16  }
  0x81   :  { %v50_v19 = vpop.permute.xlu1 %49 }
  0x83   :  { %v40_v18 = vpop.permute.xlu0 %39 }
  0x85   :  { %v55_v26 = vpop.permute.xlu1 %54 }
  0x87   :  { %v45_v20 = vpop.permute.xlu0 %44 }
  0x89   :  { %v175_v41 = vpop.permute.xlu1 %174 }
  0x8b   :  { %v170_v42 = vpop.permute.xlu0 %169 }
  0x8d   :  { %v185_v48 = vpop.permute.xlu1 %184 }
  0x8f   :  { %v180_v51 = vpop.permute.xlu0 %179 }
  0x93   :  { %v294_v60 = vpop.permute.xlu0 %293 }
  0xdb   :  { %v418_v21 = vpop.f32.mrb[0].mxu0 }
  0xdc   :  { %v142_v22 = vadd.f32 %v418_v21, %v45_v20  ;;  %v136_v23 = vpop.f32.mrb[1].mxu0 }
  0xdd   :  { %v137_v24 = vadd.f32 %v136_v23, %v40_v18 }
  0xde   :  { %v156_v25 = vmax.f32 %v142_v22, 0.0 }
  0xdf   :  { %v155_v27 = vmax.f32 %v137_v24, 0.0  ;;  %v421_v28 = vpop.f32.mrb[2].mxu0 }
  0xe0   :  { %v152_v29 = vadd.f32 %v421_v28, %v55_v26  ;;  %v146_v30 = vpop.f32.mrb[3].mxu0 }
  0xe1   :  { %v147_v31 = vadd.f32 %v146_v30, %v50_v19  ;;  %v451_v32 = vpack.c.bf16 %v156_v25, %v155_v27 }
  0xe2   :  { %v158_v33 = vmax.f32 %v152_v29, 0.0 }
  0xe3   :  { %v157_v34 = vmax.f32 %v147_v31, 0.0  ;;  %452 = vmatprep.subr.bf16.mxu1 %v451_v32 }
  0xe4   :  { %454 = vmatpush3.bf16.msra.mxu1 %v451_v32 }
  0xe5   :  { %v455_v35 = vpack.c.bf16 %v158_v33, %v157_v34 }
  0xe7   :  { %456 = vmatprep.subr.bf16.mxu1 %v455_v35 }
  0xe8   :  { %458 = vmatpush3.bf16.msra.mxu1 %v455_v35 }
  0xeb   :  { %431 = vmatmul.mubr.msk.f32.vlgmr.msra.gmra.mrb[0].mxu1 %vm187_vm1, %v160_v36 }
  0xec   :  { %433 = vmatprep.mubr.msk.f32.mxu1 %vm187_vm1, %v161_v37 }
  0xef   :  { %434 = vmatmul.mubr.msk.f32.gmra.mrb[2].mxu1 %vm187_vm1, %v162_v38 }
 0x1be   :  { %v432_v43 = vpop.f32.mrb[0].mxu1 }
 0x1bf   :  { %v272_v44 = vadd.f32 %v432_v43, %v175_v41  ;;  %v266_v45 = vpop.f32.mrb[1].mxu1 }
 0x1c0   :  { %v267_v46 = vadd.f32 %v266_v45, %v170_v42 }
 0x1c1   :  { %v286_v47 = vmax.f32 %v272_v44, 0.0 }
 0x1c2   :  { %v285_v49 = vmax.f32 %v267_v46, 0.0  ;;  %v435_v50 = vpop.f32.mrb[2].mxu1 }
 0x1c3   :  { %v282_v52 = vadd.f32 %v435_v50, %v185_v48  ;;  %v276_v53 = vpop.f32.mrb[3].mxu1 }
 0x1c4   :  { %v460_v54 = vpack.c.bf16 %v286_v47, %v285_v49  ;;  %v277_v55 = vadd.f32 %v276_v53, %v180_v51 }
 0x1c5   :  { %v288_v56 = vmax.f32 %v282_v52, 0.0 }
 0x1c6   :  { %v287_v57 = vmax.f32 %v277_v55, 0.0  ;;  %461 = vmatpush3.bf16.msra.mxu0 %v460_v54 }
 0x1c7   :  { %462 = vmatprep.subr.bf16.mxu0 %v497_v39 }
 0x1c8   :  { %v463_v58 = vpack.c.bf16 %v288_v56, %v287_v57 }
 0x1ca   :  { %464 = vmatpush3.bf16.msra.mxu0 %v463_v58 }
 0x1cd   :  { %445 = vmatmul.mubr.msk.f32.vlgmr.msra.gmra.mrb[4].mxu0 %vm187_vm1, %v289_v59 }
 0x2a0   :  { %v365_v61 = vpop.f32.mrb[4].mxu0 }
 0x2a1   :  { %v366_v62 = vadd.f32 %v365_v61, %v294_v60  ;;  %v446_v63 = vpop.f32.mrb[5].mxu0 }
 0x2a3   :  { %369 = vst [vmem:[#allocation2] sm:$0xff] %v366_v62 }
 0x2a4   :  { %483 = shalt.err (!%p480_p4)
}
 0x2a5   :  { %s484_s5 = scalar_lea.hbm %s629_s7, 128 }
 0x2a6   :  { %p485_p5 = scmp.ne.s32.totalorder %s629_s7, %s484_s5  ;;  %p488_p6 = scmp.lt.u32.totalorder %s484_s5, %s629_s7 }
 0x2a8   :  { %p490_p7 = pnand %p488_p6, %p485_p5 }
 0x2aa   :  { %493 = shalt.err (!%p490_p7)
}
 0x2ab   :  { %379 = dma.vmem_to_hbm [thread:$0]  %s377_s12, 128, %s629_s7, [#allocation3]  }
 0x2ac   :  { %494 = dma.done.wait [#allocation3], 128  }
 0x2ad   :  { %495 = vsyncadd [#allocation3], 4294967168 }
 0x2ae   :  { %383 = vsyncpa [#allocation3], 1 }

</bundles_post_ra>
